<compile_context>
chip_gen: v5e
topology: v5e:2x2
jax: 0.10.0
libtpu: 0.0.40
codegen_flags: <defaults>
</compile_context>

<pallas_src>
import functools

import jax
import jax.numpy as jnp
from jax.experimental import pallas as pl
from jax.experimental.pallas import tpu as pltpu


def _round_up(v, m):
    return (v + m - 1) // m * m


def _cdiv(a, b):
    return -(-a // b)


def _vmem_limit_bytes():
    """Generation-aware VMEM budget with ~25% headroom (capped at 100 MiB)."""
    cap = 0
    try:
        cap = int(getattr(pltpu.get_tpu_info(), "vmem_capacity_bytes", 0))
    except Exception:
        cap = 0
    if cap <= 0:
        cap = 64 * 1024 * 1024  # conservative default (v7x-sized)
    return min(cap * 3 // 4, 100 * 1024 * 1024)


def _choose_tile_n(n, tile_n_max):
    """8-aligned row tile: big (amortizes per-step overhead), low padding waste,
    and >=2 grid steps when possible so v7x's two TensorCores both get rows."""
    n8 = _round_up(max(n, 1), 8)
    tile_n = min(tile_n_max, n8)
    n_pad = _round_up(n8, tile_n)
    steps = max(_cdiv(n_pad, tile_n), 2 if n8 >= 16 else 1)
    tile_n = _round_up(_cdiv(n8, steps), 8)
    n_pad = tile_n * steps
    return tile_n, n_pad


def _fused_mlp_kernel(*refs, num_layers, out_size):
    # refs = (x_ref, w1_ref, b1_ref, w2_ref, b2_ref, ..., o_ref)
    x_ref = refs[0]
    o_ref = refs[-1]
    param_refs = refs[1:-1]

    h = x_ref[...].astype(jnp.float32)
    for i in range(num_layers):
        w_ref = param_refs[2 * i]      # (fan_in[_pad], fan_out_pad) bf16
        b_ref = param_refs[2 * i + 1]  # (1, fan_out_pad) f32
        # bf16 MXU matmul, f32 accumulation.
        h = jnp.dot(h.astype(jnp.bfloat16), w_ref[...],
                    preferred_element_type=jnp.float32)
        h = h + b_ref[...]
        if i < num_layers - 1:          # last layer has no activation
            h = jnp.maximum(h, 0.0)     # ReLU (Dropout in eval mode = identity)
    # Only the real output columns are stored (output stays unpadded in HBM).
    o_ref[...] = h[:, :out_size].astype(o_ref.dtype)


def prepare_mlp_params(params, *, lane_pad=128, weight_dtype=jnp.bfloat16):
    """Pad + cast parameters ONCE (hoisted out of the per-call path).

    params: list of (w_t, b), w_t of shape (fan_in, fan_out), b of shape (fan_out,).
    Returns list of (w_padded bf16, b_padded f32) where:
      * layer 0 keeps its real fan_in (so x needs no HBM padding),
      * every fan_out is padded to a multiple of `lane_pad` (zero-filled),
      * layer i>0 fan_in equals layer i-1's padded fan_out.
    Padded rows/cols are zero -> mathematically inert (ReLU(0) = 0).
    """
    prepared = []
    prev_out_pad = None
    for li, (w_t, b) in enumerate(params):
        fi, fo = w_t.shape
        fi_p = fi if li == 0 else prev_out_pad
        fo_p = _round_up(fo, lane_pad)
        w_p = jnp.zeros((fi_p, fo_p), weight_dtype).at[:fi, :fo].set(
            w_t.astype(weight_dtype))
        b_p = jnp.zeros((1, fo_p), jnp.float32).at[0, :fo].set(
            b.astype(jnp.float32))
        prepared.append((w_p, b_p))
        prev_out_pad = fo_p
    return prepared


def mlp_forward(x, prepared_params, out_size, *, tile_n_max=1024):
    """Fused MLP forward: (Linear -> Dropout(eval=id) -> ReLU)* -> Linear.

    x:               (N, in_size) float32, unpadded.
    prepared_params: output of prepare_mlp_params (padded bf16 weights, f32 biases).
    out_size:        real (unpadded) output width.
    """
    n, in_size = x.shape
    num_layers = len(prepared_params)
    assert prepared_params[0][0].shape[0] == in_size, "in_size mismatch"

    tile_n, n_pad = _choose_tile_n(n, tile_n_max)
    # Only row padding (if needed); feature dim stays at its real width.
    x_in = x if n_pad == n else jnp.zeros((n_pad, in_size), x.dtype).at[:n].set(x)

    flat_params = []
    for (w_p, b_p) in prepared_params:
        flat_params.extend([w_p, b_p])

    # ---- cost estimate -------------------------------------------------------
    flops = 2 * n_pad * sum(w.shape[0] * w.shape[1] for (w, _) in prepared_params)
    bytes_accessed = (x_in.size * x_in.dtype.itemsize
                      + n_pad * out_size * x.dtype.itemsize
                      + sum(int(p.size) * p.dtype.itemsize for p in flat_params))

    kernel = functools.partial(_fused_mlp_kernel,
                               num_layers=num_layers, out_size=out_size)

    x_spec = pl.BlockSpec((tile_n, in_size), lambda i: (i, 0))
    out_spec = pl.BlockSpec((tile_n, out_size), lambda i: (i, 0))
    vmem_limit = _vmem_limit_bytes()
    grid = (n_pad // tile_n,)

    def run(single_buffer_params):
        param_specs = []
        for p in flat_params:
            # Constant index_map -> params stay VMEM-resident across all grid
            # steps. Buffered(1): no point double-buffering something that is
            # never re-fetched (halves resident VMEM, matters on v7x's 64 MiB).
            if single_buffer_params:
                spec = pl.BlockSpec(p.shape, lambda i: (0, 0),
                                    pipeline_mode=pl.Buffered(1))
            else:
                spec = pl.BlockSpec(p.shape, lambda i: (0, 0))
            param_specs.append(spec)

        return pl.pallas_call(
            kernel,
            out_shape=jax.ShapeDtypeStruct((n_pad, out_size), x.dtype),
            grid_spec=pltpu.PrefetchScalarGridSpec(
                num_scalar_prefetch=0,
                grid=grid,
                in_specs=[x_spec] + param_specs,
                out_specs=out_spec,
            ),
            compiler_params=pltpu.CompilerParams(
                dimension_semantics=("parallel",),
                vmem_limit_bytes=vmem_limit,
            ),
            cost_estimate=pl.CostEstimate(
                flops=flops, transcendentals=0, bytes_accessed=bytes_accessed),
        )(x_in, *flat_params)

    use_single_buffer = hasattr(pl, "Buffered")
    try:
        out_padded = run(use_single_buffer)
    except Exception:
        if not use_single_buffer:
            raise
        out_padded = run(False)  # fallback: default double-buffered params

    return out_padded[:n] if n_pad != n else out_padded


def init_mlp_params(key, layer_num, in_size, hidden_size, out_size,
                    dtype=jnp.float32):
    """Deterministic parameter init mirroring nn.Linear shapes.

    PyTorch nn.Linear(in, out) has weight (out, in) and bias (out,); we store
    the transposed weight (in, out). Mirrors the original layer structure
    (assumes layer_num >= 2):
      Linear(in, hidden) -> ... Linear(hidden, hidden) ... -> Linear(hidden, out)
    """
    sizes = []
    for layer_id in range(layer_num):
        if layer_id == 0:
            sizes.append((in_size, hidden_size))
        elif layer_id < layer_num - 1:
            sizes.append((hidden_size, hidden_size))
        else:
            sizes.append((hidden_size, out_size))
    params = []
    for (fan_in, fan_out) in sizes:
        key, wk, bk = jax.random.split(key, 3)
        bound = 1.0 / jnp.sqrt(fan_in)
        w_t = jax.random.uniform(wk, (fan_in, fan_out), dtype,
                                 minval=-bound, maxval=bound)
        b = jax.random.uniform(bk, (fan_out,), dtype,
                               minval=-bound, maxval=bound)
        params.append((w_t, b))
    return params


def mlp_reference(x, params):
    """Pure-JAX float32 reference for correctness checking."""
    n_layers = len(params)
    h = x
    for i, (w_t, b) in enumerate(params):
        h = h @ w_t + b
        if i < n_layers - 1:
            h = jnp.maximum(h, 0.0)
    return h


if __name__ == "__main__":
    key = jax.random.PRNGKey(0)
    key, xk, pk, xk2 = jax.random.split(key, 4)

    # Shapes consistent with MLP(layer_num=3, in_size=16, hidden=32, out=8)
    batch = 8
    layer_num, in_size, hidden_size, out_size = 3, 16, 32, 8

    raw_params = init_mlp_params(pk, layer_num, in_size, hidden_size, out_size)
    # Pad + bf16-cast ONCE (hoisted out of the forward path).
    params = prepare_mlp_params(raw_params)

    # bf16 MXU inputs with f32 accumulation -> loosened tolerance vs f32 ref.
    ATOL, RTOL = 2e-2, 5e-2

    # --- check 1: small batch (single grid step) ------------------------------
    x = jax.random.normal(xk, (batch, in_size), jnp.float32)
    out = jax.block_until_ready(mlp_forward(x, params, out_size))
    ref = mlp_reference(x, raw_params)
    assert out.shape == (batch, out_size), out.shape
    assert jnp.allclose(out, ref, atol=ATOL, rtol=RTOL), "mismatch vs reference"

    # --- check 2: larger, non-multiple batch (adaptive tile, 2 grid steps) ----
    batch2 = 300
    x2 = jax.random.normal(xk2, (batch2, in_size), jnp.float32)
    out2 = jax.block_until_ready(mlp_forward(x2, params, out_size))
    ref2 = mlp_reference(x2, raw_params)
    assert out2.shape == (batch2, out_size), out2.shape
    assert jnp.allclose(out2, ref2, atol=ATOL, rtol=RTOL), "mismatch vs reference (batch2)"

    print("KERNEL_OK")
</pallas_src>

<mosaic_0001>
module attributes {stable_mosaic.version = 11 : i64} {
  func.func @_fused_mlp_kernel(%arg0: i32, %arg1: memref<8x16xf32, #tpu.memory_space<vmem>>, %arg2: memref<16x128xbf16, #tpu.memory_space<vmem>>, %arg3: memref<1x128xf32, #tpu.memory_space<vmem>>, %arg4: memref<128x128xbf16, #tpu.memory_space<vmem>>, %arg5: memref<1x128xf32, #tpu.memory_space<vmem>>, %arg6: memref<128x128xbf16, #tpu.memory_space<vmem>>, %arg7: memref<1x128xf32, #tpu.memory_space<vmem>>, %arg8: memref<8x8xf32, #tpu.memory_space<vmem>>) attributes {dimension_semantics = [#tpu.dimension_semantics<parallel>], iteration_bounds = array<i64: 1>, scalar_prefetch = 0 : i64, scratch_operands = 0 : i64, tpu.core_type = #tpu.core_type<tc>, window_params = [{transform_indices = @transform_0, window_bounds = array<i64: 8, 16>}, {pipeline_mode = #tpu.pipeline_mode<synchronous>, transform_indices = @transform_1, window_bounds = array<i64: 16, 128>}, {pipeline_mode = #tpu.pipeline_mode<synchronous>, transform_indices = @transform_2, window_bounds = array<i64: 1, 128>}, {pipeline_mode = #tpu.pipeline_mode<synchronous>, transform_indices = @transform_3, window_bounds = array<i64: 128, 128>}, {pipeline_mode = #tpu.pipeline_mode<synchronous>, transform_indices = @transform_4, window_bounds = array<i64: 1, 128>}, {pipeline_mode = #tpu.pipeline_mode<synchronous>, transform_indices = @transform_5, window_bounds = array<i64: 128, 128>}, {pipeline_mode = #tpu.pipeline_mode<synchronous>, transform_indices = @transform_6, window_bounds = array<i64: 1, 128>}, {transform_indices = @transform_7, window_bounds = array<i64: 8, 8>}]} {
    %c0 = arith.constant 0 : index
    %c0_0 = arith.constant 0 : index
    %0 = vector.load %arg1[%c0, %c0_0] : memref<8x16xf32, #tpu.memory_space<vmem>>, vector<8x16xf32>
    %1 = arith.truncf %0 : vector<8x16xf32> to vector<8x16xbf16>
    %c0_1 = arith.constant 0 : index
    %c0_2 = arith.constant 0 : index
    %2 = vector.load %arg2[%c0_1, %c0_2] : memref<16x128xbf16, #tpu.memory_space<vmem>>, vector<16x128xbf16>
    %cst = arith.constant dense<0.000000e+00> : vector<8x128xf32>
    %3 = tpu.matmul %1, %2, %cst {dimension_numbers = #tpu.dot_dimension_numbers<[1], [0], [0], [1], [0, 0, 1, 1], [], []>} : vector<8x16xbf16>, vector<16x128xbf16>, vector<8x128xf32> -> vector<8x128xf32>
    %c0_3 = arith.constant 0 : index
    %c0_4 = arith.constant 0 : index
    %4 = vector.load %arg3[%c0_3, %c0_4] : memref<1x128xf32, #tpu.memory_space<vmem>>, vector<1x128xf32>
    %5 = vector.broadcast %4 : vector<1x128xf32> to vector<8x128xf32>
    %6 = arith.addf %3, %5 : vector<8x128xf32>
    %cst_5 = arith.constant 0.000000e+00 : f32
    %7 = vector.broadcast %cst_5 : f32 to vector<8x128xf32>
    %8 = arith.maximumf %6, %7 : vector<8x128xf32>
    %9 = arith.truncf %8 : vector<8x128xf32> to vector<8x128xbf16>
    %c0_6 = arith.constant 0 : index
    %c0_7 = arith.constant 0 : index
    %10 = vector.load %arg4[%c0_6, %c0_7] : memref<128x128xbf16, #tpu.memory_space<vmem>>, vector<128x128xbf16>
    %cst_8 = arith.constant dense<0.000000e+00> : vector<8x128xf32>
    %11 = tpu.matmul %9, %10, %cst_8 {dimension_numbers = #tpu.dot_dimension_numbers<[1], [0], [0], [1], [0, 0, 1, 1], [], []>} : vector<8x128xbf16>, vector<128x128xbf16>, vector<8x128xf32> -> vector<8x128xf32>
    %c0_9 = arith.constant 0 : index
    %c0_10 = arith.constant 0 : index
    %12 = vector.load %arg5[%c0_9, %c0_10] : memref<1x128xf32, #tpu.memory_space<vmem>>, vector<1x128xf32>
    %13 = vector.broadcast %12 : vector<1x128xf32> to vector<8x128xf32>
    %14 = arith.addf %11, %13 : vector<8x128xf32>
    %cst_11 = arith.constant 0.000000e+00 : f32
    %15 = vector.broadcast %cst_11 : f32 to vector<8x128xf32>
    %16 = arith.maximumf %14, %15 : vector<8x128xf32>
    %17 = arith.truncf %16 : vector<8x128xf32> to vector<8x128xbf16>
    %c0_12 = arith.constant 0 : index
    %c0_13 = arith.constant 0 : index
    %18 = vector.load %arg6[%c0_12, %c0_13] : memref<128x128xbf16, #tpu.memory_space<vmem>>, vector<128x128xbf16>
    %cst_14 = arith.constant dense<0.000000e+00> : vector<8x128xf32>
    %19 = tpu.matmul %17, %18, %cst_14 {dimension_numbers = #tpu.dot_dimension_numbers<[1], [0], [0], [1], [0, 0, 1, 1], [], []>} : vector<8x128xbf16>, vector<128x128xbf16>, vector<8x128xf32> -> vector<8x128xf32>
    %c0_15 = arith.constant 0 : index
    %c0_16 = arith.constant 0 : index
    %20 = vector.load %arg7[%c0_15, %c0_16] : memref<1x128xf32, #tpu.memory_space<vmem>>, vector<1x128xf32>
    %21 = vector.broadcast %20 : vector<1x128xf32> to vector<8x128xf32>
    %22 = arith.addf %19, %21 : vector<8x128xf32>
    %23 = vector.extract_strided_slice %22 {offsets = [0, 0], sizes = [8, 8], strides = [1, 1]} : vector<8x128xf32> to vector<8x8xf32>
    %c0_17 = arith.constant 0 : index
    %c0_18 = arith.constant 0 : index
    %24 = vector.load %arg8[%c0_17, %c0_18] : memref<8x8xf32, #tpu.memory_space<vmem>>, vector<8x8xf32>
    tpu.vector_store %arg8[%c0_17, %c0_18], %23 {strides = array<i32>} : memref<8x8xf32, #tpu.memory_space<vmem>>, vector<8x8xf32>,
    return
  }
  func.func @transform_0(%arg0: i32) -> (i32, i32) {
    %c0_i32 = arith.constant 0 : i32
    %c0_i32_0 = arith.constant 0 : i32
    return %arg0, %c0_i32 : i32, i32
  }
  func.func @transform_1(%arg0: i32) -> (i32, i32) {
    %c0_i32 = arith.constant 0 : i32
    %c0_i32_0 = arith.constant 0 : i32
    %c0_i32_1 = arith.constant 0 : i32
    return %c0_i32, %c0_i32_0 : i32, i32
  }
  func.func @transform_2(%arg0: i32) -> (i32, i32) {
    %c0_i32 = arith.constant 0 : i32
    %c0_i32_0 = arith.constant 0 : i32
    %c0_i32_1 = arith.constant 0 : i32
    return %c0_i32, %c0_i32_0 : i32, i32
  }
  func.func @transform_3(%arg0: i32) -> (i32, i32) {
    %c0_i32 = arith.constant 0 : i32
    %c0_i32_0 = arith.constant 0 : i32
    %c0_i32_1 = arith.constant 0 : i32
    return %c0_i32, %c0_i32_0 : i32, i32
  }
  func.func @transform_4(%arg0: i32) -> (i32, i32) {
    %c0_i32 = arith.constant 0 : i32
    %c0_i32_0 = arith.constant 0 : i32
    %c0_i32_1 = arith.constant 0 : i32
    return %c0_i32, %c0_i32_0 : i32, i32
  }
  func.func @transform_5(%arg0: i32) -> (i32, i32) {
    %c0_i32 = arith.constant 0 : i32
    %c0_i32_0 = arith.constant 0 : i32
    %c0_i32_1 = arith.constant 0 : i32
    return %c0_i32, %c0_i32_0 : i32, i32
  }
  func.func @transform_6(%arg0: i32) -> (i32, i32) {
    %c0_i32 = arith.constant 0 : i32
    %c0_i32_0 = arith.constant 0 : i32
    %c0_i32_1 = arith.constant 0 : i32
    return %c0_i32, %c0_i32_0 : i32, i32
  }
  func.func @transform_7(%arg0: i32) -> (i32, i32) {
    %c0_i32 = arith.constant 0 : i32
    %c0_i32_0 = arith.constant 0 : i32
    return %arg0, %c0_i32 : i32, i32
  }
}

module attributes {stable_mosaic.version = 11 : i64} {
  func.func @_fused_mlp_kernel(%arg0: i32, %arg1: memref<8x16xf32, #tpu.memory_space<vmem>>, %arg2: memref<16x128xbf16, #tpu.memory_space<vmem>>, %arg3: memref<1x128xf32, #tpu.memory_space<vmem>>, %arg4: memref<128x128xbf16, #tpu.memory_space<vmem>>, %arg5: memref<1x128xf32, #tpu.memory_space<vmem>>, %arg6: memref<128x128xbf16, #tpu.memory_space<vmem>>, %arg7: memref<1x128xf32, #tpu.memory_space<vmem>>, %arg8: memref<8x8xf32, #tpu.memory_space<vmem>>) attributes {dimension_semantics = [#tpu.dimension_semantics<parallel>], iteration_bounds = array<i64: 1>, scalar_prefetch = 0 : i64, scratch_operands = 0 : i64, tpu.core_type = #tpu.core_type<tc>, window_params = [{transform_indices = @transform_0, window_bounds = array<i64: 8, 16>}, {pipeline_mode = #tpu.pipeline_mode<synchronous>, transform_indices = @transform_1, window_bounds = array<i64: 16, 128>}, {pipeline_mode = #tpu.pipeline_mode<synchronous>, transform_indices = @transform_2, window_bounds = array<i64: 1, 128>}, {pipeline_mode = #tpu.pipeline_mode<synchronous>, transform_indices = @transform_3, window_bounds = array<i64: 128, 128>}, {pipeline_mode = #tpu.pipeline_mode<synchronous>, transform_indices = @transform_4, window_bounds = array<i64: 1, 128>}, {pipeline_mode = #tpu.pipeline_mode<synchronous>, transform_indices = @transform_5, window_bounds = array<i64: 128, 128>}, {pipeline_mode = #tpu.pipeline_mode<synchronous>, transform_indices = @transform_6, window_bounds = array<i64: 1, 128>}, {transform_indices = @transform_7, window_bounds = array<i64: 8, 8>}]} {
    %c0 = arith.constant 0 : index
    %c0_0 = arith.constant 0 : index
    %0 = vector.load %arg1[%c0, %c0_0] : memref<8x16xf32, #tpu.memory_space<vmem>>, vector<8x16xf32>
    %1 = arith.truncf %0 : vector<8x16xf32> to vector<8x16xbf16>
    %c0_1 = arith.constant 0 : index
    %c0_2 = arith.constant 0 : index
    %2 = vector.load %arg2[%c0_1, %c0_2] : memref<16x128xbf16, #tpu.memory_space<vmem>>, vector<16x128xbf16>
    %cst = arith.constant dense<0.000000e+00> : vector<8x128xf32>
    %3 = tpu.matmul %1, %2, %cst {dimension_numbers = #tpu.dot_dimension_numbers<[1], [0], [0], [1], [0, 0, 1, 1], [], []>} : vector<8x16xbf16>, vector<16x128xbf16>, vector<8x128xf32> -> vector<8x128xf32>
    %c0_3 = arith.constant 0 : index
    %c0_4 = arith.constant 0 : index
    %4 = vector.load %arg3[%c0_3, %c0_4] : memref<1x128xf32, #tpu.memory_space<vmem>>, vector<1x128xf32>
    %5 = vector.broadcast %4 : vector<1x128xf32> to vector<8x128xf32>
    %6 = arith.addf %3, %5 : vector<8x128xf32>
    %cst_5 = arith.constant 0.000000e+00 : f32
    %7 = vector.broadcast %cst_5 : f32 to vector<8x128xf32>
    %8 = arith.maximumf %6, %7 : vector<8x128xf32>
    %9 = arith.truncf %8 : vector<8x128xf32> to vector<8x128xbf16>
    %c0_6 = arith.constant 0 : index
    %c0_7 = arith.constant 0 : index
    %10 = vector.load %arg4[%c0_6, %c0_7] : memref<128x128xbf16, #tpu.memory_space<vmem>>, vector<128x128xbf16>
    %cst_8 = arith.constant dense<0.000000e+00> : vector<8x128xf32>
    %11 = tpu.matmul %9, %10, %cst_8 {dimension_numbers = #tpu.dot_dimension_numbers<[1], [0], [0], [1], [0, 0, 1, 1], [], []>} : vector<8x128xbf16>, vector<128x128xbf16>, vector<8x128xf32> -> vector<8x128xf32>
    %c0_9 = arith.constant 0 : index
    %c0_10 = arith.constant 0 : index
    %12 = vector.load %arg5[%c0_9, %c0_10] : memref<1x128xf32, #tpu.memory_space<vmem>>, vector<1x128xf32>
    %13 = vector.broadcast %12 : vector<1x128xf32> to vector<8x128xf32>
    %14 = arith.addf %11, %13 : vector<8x128xf32>
    %cst_11 = arith.constant 0.000000e+00 : f32
    %15 = vector.broadcast %cst_11 : f32 to vector<8x128xf32>
    %16 = arith.maximumf %14, %15 : vector<8x128xf32>
    %17 = arith.truncf %16 : vector<8x128xf32> to vector<8x128xbf16>
    %c0_12 = arith.constant 0 : index
    %c0_13 = arith.constant 0 : index
    %18 = vector.load %arg6[%c0_12, %c0_13] : memref<128x128xbf16, #tpu.memory_space<vmem>>, vector<128x128xbf16>
    %cst_14 = arith.constant dense<0.000000e+00> : vector<8x128xf32>
    %19 = tpu.matmul %17, %18, %cst_14 {dimension_numbers = #tpu.dot_dimension_numbers<[1], [0], [0], [1], [0, 0, 1, 1], [], []>} : vector<8x128xbf16>, vector<128x128xbf16>, vector<8x128xf32> -> vector<8x128xf32>
    %c0_15 = arith.constant 0 : index
    %c0_16 = arith.constant 0 : index
    %20 = vector.load %arg7[%c0_15, %c0_16] : memref<1x128xf32, #tpu.memory_space<vmem>>, vector<1x128xf32>
    %21 = vector.broadcast %20 : vector<1x128xf32> to vector<8x128xf32>
    %22 = arith.addf %19, %21 : vector<8x128xf32>
    %23 = vector.extract_strided_slice %22 {offsets = [0, 0], sizes = [8, 8], strides = [1, 1]} : vector<8x128xf32> to vector<8x8xf32>
    %c0_17 = arith.constant 0 : index
    %c0_18 = arith.constant 0 : index
    %24 = vector.load %arg8[%c0_17, %c0_18] : memref<8x8xf32, #tpu.memory_space<vmem>>, vector<8x8xf32>
    tpu.vector_store %arg8[%c0_17, %c0_18], %23 {strides = array<i32>} : memref<8x8xf32, #tpu.memory_space<vmem>>, vector<8x8xf32>,
    return
  }
  func.func @transform_0(%arg0: i32) -> (i32, i32) {
    %c0_i32 = arith.constant 0 : i32
    %c0_i32_0 = arith.constant 0 : i32
    return %arg0, %c0_i32 : i32, i32
  }
  func.func @transform_1(%arg0: i32) -> (i32, i32) {
    %c0_i32 = arith.constant 0 : i32
    %c0_i32_0 = arith.constant 0 : i32
    %c0_i32_1 = arith.constant 0 : i32
    return %c0_i32, %c0_i32_0 : i32, i32
  }
  func.func @transform_2(%arg0: i32) -> (i32, i32) {
    %c0_i32 = arith.constant 0 : i32
    %c0_i32_0 = arith.constant 0 : i32
    %c0_i32_1 = arith.constant 0 : i32
    return %c0_i32, %c0_i32_0 : i32, i32
  }
  func.func @transform_3(%arg0: i32) -> (i32, i32) {
    %c0_i32 = arith.constant 0 : i32
    %c0_i32_0 = arith.constant 0 : i32
    %c0_i32_1 = arith.constant 0 : i32
    return %c0_i32, %c0_i32_0 : i32, i32
  }
  func.func @transform_4(%arg0: i32) -> (i32, i32) {
    %c0_i32 = arith.constant 0 : i32
    %c0_i32_0 = arith.constant 0 : i32
    %c0_i32_1 = arith.constant 0 : i32
    return %c0_i32, %c0_i32_0 : i32, i32
  }
  func.func @transform_5(%arg0: i32) -> (i32, i32) {
    %c0_i32 = arith.constant 0 : i32
    %c0_i32_0 = arith.constant 0 : i32
    %c0_i32_1 = arith.constant 0 : i32
    return %c0_i32, %c0_i32_0 : i32, i32
  }
  func.func @transform_6(%arg0: i32) -> (i32, i32) {
    %c0_i32 = arith.constant 0 : i32
    %c0_i32_0 = arith.constant 0 : i32
    %c0_i32_1 = arith.constant 0 : i32
    return %c0_i32, %c0_i32_0 : i32, i32
  }
  func.func @transform_7(%arg0: i32) -> (i32, i32) {
    %c0_i32 = arith.constant 0 : i32
    %c0_i32_0 = arith.constant 0 : i32
    return %arg0, %c0_i32 : i32, i32
  }
}

</mosaic_0001>

<bundles_post_ra>
// kernel: tpu_custom_call.1
= control target key start
LH: loop header
LB: loop body
LE: loop exit
PB: predicated region body
PF: predicated region fallthrough
CT: control target
= control target key end

     0   :  { %12 = vsyncpa [#allocation3], 0  ;;  %s602_s0 = inlined_call_operand.hbm [shape: f32[8,16], index: 0, kind: input, shape index: {}]   ;;  %s603_s1 = inlined_call_operand.hbm [shape: bf16[16,128], index: 1, kind: input, shape index: {}]   ;;  %s604_s2 = inlined_call_operand.vmem [shape: f32[1,128], index: 2, kind: input, shape index: {}]   ;;  %s605_s3 = inlined_call_operand.hbm [shape: bf16[128,128], index: 3, kind: input, shape index: {}]   ;;  %s606_s4 = inlined_call_operand.vmem [shape: f32[1,128], index: 4, kind: input, shape index: {}]   ;;  %s607_s5 = inlined_call_operand.hbm [shape: bf16[128,128], index: 5, kind: input, shape index: {}]   ;;  %s608_s6 = inlined_call_operand.vmem [shape: f32[1,128], index: 6, kind: input, shape index: {}]   ;;  %s609_s7 = inlined_call_operand.hbm [shape: f32[8,8], index: 7, kind: output, shape index: {}]  }
   0x1   :  { %13 = vsyncpa [#allocation6], 0 }
   0x2   :  { %14 = vsyncpa [#allocation9], 0  ;;  %s31_s26 = sshll.u32 %s603_s1, 4  ;;  %s32_s26 = int_to_ptr.hbm [resolvable:$true] %s31_s26 }
   0x3   :  { %15 = vsyncpa [#allocation4], 0  ;;  %s531_s27 = smov [#allocation5]   ;;  %s21_s8 = sshll.u32 %s602_s0, 4  ;;  %s22_s8 = int_to_ptr.hbm [resolvable:$true] %s21_s8 }
   0x4   :  { %s33_s28 = sshll.u32 %s531_s27, 4  ;;  %s532_s9 = smov 64   ;;  %s34_s28 = int_to_ptr.vmem [resolvable:$true] %s33_s28 }
   0x5   :  { %s533_s10 = smov 4   ;;  %s534_s11 = smov [#allocation2]  }
   0x6   :  { %39 = dma.hbm_to_vmem [thread:$0]  %s32_s26, 128, %s34_s28, [#allocation6], %s532_s9, %s532_s9, %s533_s10  }
   0x7   :  { %s23_s12 = sshll.u32 %s534_s11, 4  ;;  %s46_s15 = sshll.u32 %s605_s3, 4  ;;  %s24_s12 = int_to_ptr.vmem [resolvable:$true] %s23_s12  ;;  %s47_s15 = int_to_ptr.hbm [resolvable:$true] %s46_s15 }
   0x8   :  { %26 = dma.hbm_to_vmem [thread:$0]  %s22_s8, 128, %s24_s12, [#allocation3]  }
   0x9   :  { %s61_s17 = sshll.u32 %s607_s5, 4  ;;  %s535_s18 = smov [#allocation7]   ;;  %s62_s17 = int_to_ptr.hbm [resolvable:$true] %s61_s17 }
   0xa   :  { %s48_s19 = sshll.u32 %s535_s18, 4  ;;  %s536_s0 = smov [#allocation8]   ;;  %s49_s19 = int_to_ptr.vmem [resolvable:$true] %s48_s19 }
   0xb   :  { %54 = dma.hbm_to_vmem [thread:$0]  %s47_s15, 1024, %s49_s19, [#allocation6], %s532_s9, %s532_s9, %s533_s10  }
   0xc   :  { %s63_s20 = sshll.u32 %s536_s0, 4  ;;  %s64_s20 = int_to_ptr.vmem [resolvable:$true] %s63_s20 }
   0xd   :  { %69 = dma.hbm_to_vmem [thread:$0]  %s62_s17, 1024, %s64_s20, [#allocation9], %s532_s9, %s532_s9, %s533_s10  }
   0xe   :  { %523 = dma.done.wait [#allocation3], 128  }
   0xf   :  { %524 = vsyncadd [#allocation3], 4294967168 }
  0x10   :  { %525 = dma.done.wait [#allocation6], 1152  }
  0x11   :  { %526 = vsyncadd [#allocation6], 4294966144 }
  0x12   :  { %527 = dma.done.wait [#allocation9], 1024  }
  0x13   :  { %528 = vsyncadd [#allocation9], 4294966272  ;;  %v376_v0 = vld [vmem:[#allocation5] sm:$0xff]  ;;  %v89_v1 = vld [vmem:[#allocation2] sm:$0xff]  ;;  %vm103_vm0 = vcmask 130048   ;;  %s537_s24 = smov [#allocation10]  }
  0x14   :  { %v384_v2 = vld [vmem:[#allocation7 + $0x38] sm:$0xff]  ;;  %v90_v3 = vpack.c.bf16 %v89_v1, %v89_v1  ;;  %114 = vmatpush.bf16.msra.mxu0 %v376_v0  ;;  %v383_v4 = vld [vmem:[#allocation7 + $0x30] sm:$0xff]  ;;  %v382_v5 = vld [vmem:[#allocation7 + $0x28] sm:$0xff]  ;;  %s293_s25 = sshll.u32 %s537_s24, 4  ;;  %s295_s28 = sshll.u32 %s609_s7, 4  ;;  %vm286_vm1 = vcmask 64512   ;;  %s294_s25 = int_to_ptr.vmem [resolvable:$true] %s293_s25  ;;  %s296_s28 = int_to_ptr.hbm [resolvable:$true] %s295_s28 }
  0x15   :  { %190 = vmatpush.bf16.msra.mxu1 %v384_v2  ;;  %v381_v6 = vld [vmem:[#allocation7 + $0x20] sm:$0xff]  ;;  %v380_v7 = vld [vmem:[#allocation7 + $0x18] sm:$0xff]  ;;  %v379_v8 = vld [vmem:[#allocation7 + $0x10] sm:$0xff] }
  0x16   :  { %v378_v9 = vld [vmem:[#allocation7 + $0x8] sm:$0xff]  ;;  %v377_v10 = vld [vmem:[#allocation7] sm:$0xff]  ;;  %v392_v11 = vld [vmem:[#allocation8 + $0x38] sm:$0xff] }
  0x17   :  { %311 = vmatmul.msk.bf16.vlgmr.msra.gmra.mxu0 %vm103_vm0, %v90_v3  ;;  %273 = vmatpush.bf16.msra.mxu2 %v392_v11  ;;  %v391_v12 = vld [vmem:[#allocation8 + $0x30] sm:$0xff]  ;;  %v390_v13 = vld [vmem:[#allocation8 + $0x28] sm:$0xff]  ;;  %v389_v14 = vld [vmem:[#allocation8 + $0x20] sm:$0xff] }
  0x18   :  { %v388_v15 = vld [vmem:[#allocation8 + $0x18] sm:$0xff]  ;;  %v387_v16 = vld [vmem:[#allocation8 + $0x10] sm:$0xff]  ;;  %v386_v23 = vld [vmem:[#allocation8 + $0x8] sm:$0xff] }
  0x19   :  { %191 = vmatpush.bf16.msra.mxu1 %v383_v4  ;;  %v400_v17 = vld [vmem:[%s604_s2] ss:$0 sm:$0xff]  ;;  %v385_v24 = vld [vmem:[#allocation8] sm:$0xff] }
  0x1a   :  { %v401_v25 = vld [vmem:[%s606_s4] ss:$0 sm:$0xff] }
  0x1b   :  { %274 = vmatpush.bf16.msra.mxu2 %v391_v12  ;;  %v402_v31 = vld [vmem:[%s608_s6] ss:$0 sm:$0xff] }
  0x1d   :  { %192 = vmatpush.bf16.msra.mxu1 %v382_v5 }
  0x1f   :  { %275 = vmatpush.bf16.msra.mxu2 %v390_v13 }
  0x21   :  { %193 = vmatpush.bf16.msra.mxu1 %v381_v6 }
  0x23   :  { %276 = vmatpush.bf16.msra.mxu2 %v389_v14 }
  0x25   :  { %194 = vmatpush.bf16.msra.mxu1 %v380_v7 }
  0x27   :  { %277 = vmatpush.bf16.msra.mxu2 %v388_v15 }
  0x29   :  { %195 = vmatpush.bf16.msra.mxu1 %v379_v8 }
  0x2b   :  { %278 = vmatpush.bf16.msra.mxu2 %v387_v16 }
  0x2d   :  { %196 = vmatpush.bf16.msra.mxu1 %v378_v9 }
  0x2f   :  { %279 = vmatpush.bf16.msra.mxu2 %v386_v23 }
  0x31   :  { %197 = vmatpush.bf16.msra.mxu1 %v377_v10 }
  0x33   :  { %280 = vmatpush.bf16.msra.mxu2 %v385_v24 }
  0x94   :  { %v116_v18 = vpop.f32.mrf.mxu0 }
  0x95   :  { %v117_v19 = vadd.f32 %v400_v17, %v116_v18 }
  0x97   :  { %v120_v20 = vmax.f32 %v117_v19, 0.0 }
  0x99   :  { %v121_v21 = vpack.c.bf16 %v120_v20, %v120_v20 }
  0x9b   :  { %198 = vmatmul.bf16.vlgmr.msra.gmra.mxu1 %v121_v21 }
  0x9c   :  { %v118_v22 = vpop.f32.mrf.mxu0 }
 0x118   :  { %v199_v26 = vpop.f32.mrf.mxu1 }
 0x119   :  { %v200_v27 = vadd.f32 %v401_v25, %v199_v26 }
 0x11b   :  { %v203_v28 = vmax.f32 %v200_v27, 0.0 }
 0x11d   :  { %v204_v29 = vpack.c.bf16 %v203_v28, %v203_v28 }
 0x11f   :  { %281 = vmatmul.bf16.vlgmr.msra.gmra.mxu2 %v204_v29 }
 0x120   :  { %v201_v30 = vpop.f32.mrf.mxu1 }
 0x1a2   :  { %v282_v32 = vpop.f32.mrf.mxu2 }
 0x1a3   :  { %v283_v33 = vadd.f32 %v402_v31, %v282_v32 }
 0x1a5   :  { %287 = vst.msk [vmem:[#allocation10] sm:$0xff] %vm286_vm1, %v283_v33 }
 0x1a6   :  { %298 = dma.vmem_to_hbm [thread:$0]  %s294_s25, 128, %s296_s28, [#allocation4]  }
 0x1aa   :  { %v284_v34 = vpop.f32.mrf.mxu2 }
 0x1ab   :  { %529 = dma.done.wait [#allocation4], 128  }
 0x1ac   :  { %530 = vsyncadd [#allocation4], 4294967168 }
 0x1ad   :  { %303 = vsyncpa [#allocation3], 1 }
 0x1ae   :  { %304 = vsyncpa [#allocation6], 1 }
 0x1af   :  { %305 = vsyncpa [#allocation9], 1 }
 0x1b0   :  { %306 = vsyncpa [#allocation4], 1 }

// kernel: tpu_custom_call.1
= control target key start
LH: loop header
LB: loop body
LE: loop exit
PB: predicated region body
PF: predicated region fallthrough
CT: control target
= control target key end

     0   :  { %12 = vsyncpa [#allocation3], 0  ;;  %s602_s0 = inlined_call_operand.hbm [shape: f32[8,16], index: 0, kind: input, shape index: {}]   ;;  %s603_s1 = inlined_call_operand.hbm [shape: bf16[16,128], index: 1, kind: input, shape index: {}]   ;;  %s604_s2 = inlined_call_operand.vmem [shape: f32[1,128], index: 2, kind: input, shape index: {}]   ;;  %s605_s3 = inlined_call_operand.hbm [shape: bf16[128,128], index: 3, kind: input, shape index: {}]   ;;  %s606_s4 = inlined_call_operand.vmem [shape: f32[1,128], index: 4, kind: input, shape index: {}]   ;;  %s607_s5 = inlined_call_operand.hbm [shape: bf16[128,128], index: 5, kind: input, shape index: {}]   ;;  %s608_s6 = inlined_call_operand.vmem [shape: f32[1,128], index: 6, kind: input, shape index: {}]   ;;  %s609_s7 = inlined_call_operand.hbm [shape: f32[8,8], index: 7, kind: output, shape index: {}]  }
   0x1   :  { %13 = vsyncpa [#allocation6], 0 }
   0x2   :  { %14 = vsyncpa [#allocation9], 0  ;;  %s31_s26 = sshll.u32 %s603_s1, 4  ;;  %s32_s26 = int_to_ptr.hbm [resolvable:$true] %s31_s26 }
   0x3   :  { %15 = vsyncpa [#allocation4], 0  ;;  %s531_s27 = smov [#allocation5]   ;;  %s21_s8 = sshll.u32 %s602_s0, 4  ;;  %s22_s8 = int_to_ptr.hbm [resolvable:$true] %s21_s8 }
   0x4   :  { %s33_s28 = sshll.u32 %s531_s27, 4  ;;  %s532_s9 = smov 64   ;;  %s34_s28 = int_to_ptr.vmem [resolvable:$true] %s33_s28 }
   0x5   :  { %s533_s10 = smov 4   ;;  %s534_s11 = smov [#allocation2]  }
   0x6   :  { %39 = dma.hbm_to_vmem [thread:$0]  %s32_s26, 128, %s34_s28, [#allocation6], %s532_s9, %s532_s9, %s533_s10  }
   0x7   :  { %s23_s12 = sshll.u32 %s534_s11, 4  ;;  %s46_s15 = sshll.u32 %s605_s3, 4  ;;  %s24_s12 = int_to_ptr.vmem [resolvable:$true] %s23_s12  ;;  %s47_s15 = int_to_ptr.hbm [resolvable:$true] %s46_s15 }
   0x8   :  { %26 = dma.hbm_to_vmem [thread:$0]  %s22_s8, 128, %s24_s12, [#allocation3]  }
   0x9   :  { %s61_s17 = sshll.u32 %s607_s5, 4  ;;  %s535_s18 = smov [#allocation7]   ;;  %s62_s17 = int_to_ptr.hbm [resolvable:$true] %s61_s17 }
   0xa   :  { %s48_s19 = sshll.u32 %s535_s18, 4  ;;  %s536_s0 = smov [#allocation8]   ;;  %s49_s19 = int_to_ptr.vmem [resolvable:$true] %s48_s19 }
   0xb   :  { %54 = dma.hbm_to_vmem [thread:$0]  %s47_s15, 1024, %s49_s19, [#allocation6], %s532_s9, %s532_s9, %s533_s10  }
   0xc   :  { %s63_s20 = sshll.u32 %s536_s0, 4  ;;  %s64_s20 = int_to_ptr.vmem [resolvable:$true] %s63_s20 }
   0xd   :  { %69 = dma.hbm_to_vmem [thread:$0]  %s62_s17, 1024, %s64_s20, [#allocation9], %s532_s9, %s532_s9, %s533_s10  }
   0xe   :  { %523 = dma.done.wait [#allocation3], 128  }
   0xf   :  { %524 = vsyncadd [#allocation3], 4294967168 }
  0x10   :  { %525 = dma.done.wait [#allocation6], 1152  }
  0x11   :  { %526 = vsyncadd [#allocation6], 4294966144 }
  0x12   :  { %527 = dma.done.wait [#allocation9], 1024  }
  0x13   :  { %528 = vsyncadd [#allocation9], 4294966272  ;;  %v376_v0 = vld [vmem:[#allocation5] sm:$0xff]  ;;  %v89_v1 = vld [vmem:[#allocation2] sm:$0xff]  ;;  %vm103_vm0 = vcmask 130048   ;;  %s537_s24 = smov [#allocation10]  }
  0x14   :  { %v384_v2 = vld [vmem:[#allocation7 + $0x38] sm:$0xff]  ;;  %v90_v3 = vpack.c.bf16 %v89_v1, %v89_v1  ;;  %114 = vmatpush.bf16.msra.mxu0 %v376_v0  ;;  %v383_v4 = vld [vmem:[#allocation7 + $0x30] sm:$0xff]  ;;  %v382_v5 = vld [vmem:[#allocation7 + $0x28] sm:$0xff]  ;;  %s293_s25 = sshll.u32 %s537_s24, 4  ;;  %s295_s28 = sshll.u32 %s609_s7, 4  ;;  %vm286_vm1 = vcmask 64512   ;;  %s294_s25 = int_to_ptr.vmem [resolvable:$true] %s293_s25  ;;  %s296_s28 = int_to_ptr.hbm [resolvable:$true] %s295_s28 }
  0x15   :  { %190 = vmatpush.bf16.msra.mxu1 %v384_v2  ;;  %v381_v6 = vld [vmem:[#allocation7 + $0x20] sm:$0xff]  ;;  %v380_v7 = vld [vmem:[#allocation7 + $0x18] sm:$0xff]  ;;  %v379_v8 = vld [vmem:[#allocation7 + $0x10] sm:$0xff] }
  0x16   :  { %v378_v9 = vld [vmem:[#allocation7 + $0x8] sm:$0xff]  ;;  %v377_v10 = vld [vmem:[#allocation7] sm:$0xff]  ;;  %v392_v11 = vld [vmem:[#allocation8 + $0x38] sm:$0xff] }
  0x17   :  { %311 = vmatmul.msk.bf16.vlgmr.msra.gmra.mxu0 %vm103_vm0, %v90_v3  ;;  %273 = vmatpush.bf16.msra.mxu2 %v392_v11  ;;  %v391_v12 = vld [vmem:[#allocation8 + $0x30] sm:$0xff]  ;;  %v390_v13 = vld [vmem:[#allocation8 + $0x28] sm:$0xff]  ;;  %v389_v14 = vld [vmem:[#allocation8 + $0x20] sm:$0xff] }
  0x18   :  { %v388_v15 = vld [vmem:[#allocation8 + $0x18] sm:$0xff]  ;;  %v387_v16 = vld [vmem:[#allocation8 + $0x10] sm:$0xff]  ;;  %v386_v23 = vld [vmem:[#allocation8 + $0x8] sm:$0xff] }
  0x19   :  { %191 = vmatpush.bf16.msra.mxu1 %v383_v4  ;;  %v400_v17 = vld [vmem:[%s604_s2] ss:$0 sm:$0xff]  ;;  %v385_v24 = vld [vmem:[#allocation8] sm:$0xff] }
  0x1a   :  { %v401_v25 = vld [vmem:[%s606_s4] ss:$0 sm:$0xff] }
  0x1b   :  { %274 = vmatpush.bf16.msra.mxu2 %v391_v12  ;;  %v402_v31 = vld [vmem:[%s608_s6] ss:$0 sm:$0xff] }
  0x1d   :  { %192 = vmatpush.bf16.msra.mxu1 %v382_v5 }
  0x1f   :  { %275 = vmatpush.bf16.msra.mxu2 %v390_v13 }
  0x21   :  { %193 = vmatpush.bf16.msra.mxu1 %v381_v6 }
  0x23   :  { %276 = vmatpush.bf16.msra.mxu2 %v389_v14 }
  0x25   :  { %194 = vmatpush.bf16.msra.mxu1 %v380_v7 }
  0x27   :  { %277 = vmatpush.bf16.msra.mxu2 %v388_v15 }
  0x29   :  { %195 = vmatpush.bf16.msra.mxu1 %v379_v8 }
  0x2b   :  { %278 = vmatpush.bf16.msra.mxu2 %v387_v16 }
  0x2d   :  { %196 = vmatpush.bf16.msra.mxu1 %v378_v9 }
  0x2f   :  { %279 = vmatpush.bf16.msra.mxu2 %v386_v23 }
  0x31   :  { %197 = vmatpush.bf16.msra.mxu1 %v377_v10 }
  0x33   :  { %280 = vmatpush.bf16.msra.mxu2 %v385_v24 }
  0x94   :  { %v116_v18 = vpop.f32.mrf.mxu0 }
  0x95   :  { %v117_v19 = vadd.f32 %v400_v17, %v116_v18 }
  0x97   :  { %v120_v20 = vmax.f32 %v117_v19, 0.0 }
  0x99   :  { %v121_v21 = vpack.c.bf16 %v120_v20, %v120_v20 }
  0x9b   :  { %198 = vmatmul.bf16.vlgmr.msra.gmra.mxu1 %v121_v21 }
  0x9c   :  { %v118_v22 = vpop.f32.mrf.mxu0 }
 0x118   :  { %v199_v26 = vpop.f32.mrf.mxu1 }
 0x119   :  { %v200_v27 = vadd.f32 %v401_v25, %v199_v26 }
 0x11b   :  { %v203_v28 = vmax.f32 %v200_v27, 0.0 }
 0x11d   :  { %v204_v29 = vpack.c.bf16 %v203_v28, %v203_v28 }
 0x11f   :  { %281 = vmatmul.bf16.vlgmr.msra.gmra.mxu2 %v204_v29 }
 0x120   :  { %v201_v30 = vpop.f32.mrf.mxu1 }
 0x1a2   :  { %v282_v32 = vpop.f32.mrf.mxu2 }
 0x1a3   :  { %v283_v33 = vadd.f32 %v402_v31, %v282_v32 }
 0x1a5   :  { %287 = vst.msk [vmem:[#allocation10] sm:$0xff] %vm286_vm1, %v283_v33 }
 0x1a6   :  { %298 = dma.vmem_to_hbm [thread:$0]  %s294_s25, 128, %s296_s28, [#allocation4]  }
 0x1aa   :  { %v284_v34 = vpop.f32.mrf.mxu2 }
 0x1ab   :  { %529 = dma.done.wait [#allocation4], 128  }
 0x1ac   :  { %530 = vsyncadd [#allocation4], 4294967168 }
 0x1ad   :  { %303 = vsyncpa [#allocation3], 1 }
 0x1ae   :  { %304 = vsyncpa [#allocation6], 1 }
 0x1af   :  { %305 = vsyncpa [#allocation9], 1 }
 0x1b0   :  { %306 = vsyncpa [#allocation4], 1 }

</bundles_post_ra>
